<compile_context>
chip_gen: v7x
topology: tpu7x:2x2x1
jax: 0.10.0
libtpu: 0.0.40
codegen_flags: <defaults>
</compile_context>

<pallas_src>
import functools

import jax
import jax.numpy as jnp
from jax.experimental import pallas as pl
from jax.experimental.pallas import tpu as pltpu

LANE = 128


def _round_up(x, m):
    return ((x + m - 1) // m) * m


# ----------------------------------------------------------------------------
# Fused encoder + decoder Pallas kernel
# ----------------------------------------------------------------------------
def fused_encoder_decoder_kernel(xcol_ref, wc_ref, bc_ref, wd_ref, bd_ref,
                                 lsm_ref, logit_ref, act_ref,
                                 *, bB, H, W, Kp, Dp, Np):
    """Per grid step (bB images):
        conv-as-one-matmul -> bias+ReLU (into VMEM scratch) -> height mean
        -> Linear decoder -> log_softmax.  Lane-dense f32 outputs.

    xcol_ref : (bB, H*W, Kp)  bf16  im2col image (K = 9*Cin zero-padded to Kp)
    wc_ref   : (Kp, Dp)       bf16  conv weight (im2col layout, lane-padded)
    bc_ref   : (1, Dp)        f32   conv bias (padded cols = 0)
    wd_ref   : (Dp, Np)       bf16  decoder weight (padded rows/cols = 0)
    bd_ref   : (1, Np)        f32   decoder bias, padded class lanes = -1e30
    lsm_ref  : (bB, W, Np)    f32   log_softmax(logits)
    logit_ref: (bB, W, Np)    f32   raw decoder logits (for pred_rec)
    act_ref  : (bB*H*W, Dp)   f32   VMEM scratch: post-ReLU conv activations
    """
    # One K=Kp matmul replaces the previous nine K=Cin matmuls (f32 accumulate).
    lhs = xcol_ref[...].reshape(bB * H * W, Kp)
    act_ref[...] = jnp.maximum(
        jnp.dot(lhs, wc_ref[...], preferred_element_type=jnp.float32)
        + bc_ref[...], 0.0)

    # Height mean folded in: (bB, H, W, Dp) -> (bB, W, Dp), stays in f32.
    feat = jnp.mean(act_ref[...].reshape(bB, H, W, Dp), axis=1)

    # Fused Linear decoder + log_softmax.  Padded class lanes carry bias -1e30
    # (zero weight columns), so no explicit mask pass is needed: they never win
    # the max and exp() underflows to exactly 0 in the normalizer.
    logits = jnp.dot(feat.astype(jnp.bfloat16).reshape(bB * W, Dp), wd_ref[...],
                     preferred_element_type=jnp.float32) + bd_ref[...]
    m = jnp.max(logits, axis=-1, keepdims=True)
    s = jnp.sum(jnp.exp(logits - m), axis=-1, keepdims=True)
    logz = m + jnp.log(s)

    lsm_ref[...] = (logits - logz).reshape(bB, W, Np)
    logit_ref[...] = logits.reshape(bB, W, Np)


def encoder_decoder_forward(images, params, num_classes):
    """images (B, Cin, H, W) f32 -> (log_probs, logits), both (B, T=W, Np) f32."""
    B, Cin, H, W = images.shape
    Dout = params["w_conv"].shape[0]
    Dp = _round_up(Dout, LANE)           # NOTE: use 256 alignment if D > 128 (v6e/v7x MXU)
    Np = _round_up(num_classes, LANE)
    K = 9 * Cin
    Kp = _round_up(K, 32)                # sublane-align the contraction dim

    # ---- wrapper-side im2col: lane-pack the 9 taps into one K axis (bf16) ----
    x = jnp.transpose(images, (0, 2, 3, 1))                      # NHWC
    xp = jnp.pad(x, ((0, 0), (1, 1), (1, 1), (0, 0)))
    taps = [xp[:, ky:ky + H, kx:kx + W, :] for ky in range(3) for kx in range(3)]
    x_col = jnp.concatenate(taps, axis=-1)                       # (B, H, W, 9*Cin)
    x_col = jnp.pad(x_col, ((0, 0), (0, 0), (0, 0), (0, Kp - K)))
    x_col = x_col.reshape(B, H * W, Kp).astype(jnp.bfloat16)     # single bf16 cast

    # ---- weights: conv (im2col layout) + decoder, lane-padded ----
    # PyTorch conv weight (Dout, Cin, kH, kW) -> rows ordered (ky, kx, cin).
    w_col = jnp.transpose(params["w_conv"], (2, 3, 1, 0)).reshape(K, Dout)
    w_col = jnp.pad(w_col, ((0, Kp - K), (0, Dp - Dout))).astype(jnp.bfloat16)
    b_conv = jnp.pad(params["b_conv"], (0, Dp - Dout)).reshape(1, Dp).astype(jnp.float32)

    w_dec = jnp.zeros((Dp, Np), jnp.bfloat16).at[:Dout, :num_classes].set(
        params["w_dec"].astype(jnp.bfloat16))
    # Bake the padded-class mask into the bias (zero weight cols => logits=-1e30).
    b_dec = jnp.full((1, Np), -1e30, jnp.float32).at[0, :num_classes].set(
        params["b_dec"].astype(jnp.float32))

    # ---- batch tiling: amortize per-step overhead, keep grid extent >= 2 ----
    bB = max(1, min(8, B // 2))
    Bp = _round_up(B, bB)
    if Bp != B:
        x_col = jnp.pad(x_col, ((0, Bp - B), (0, 0), (0, 0)))

    kernel = functools.partial(fused_encoder_decoder_kernel,
                               bB=bB, H=H, W=W, Kp=Kp, Dp=Dp, Np=Np)
    lsm, logits = pl.pallas_call(
        kernel,
        out_shape=(jax.ShapeDtypeStruct((Bp, W, Np), jnp.float32),
                   jax.ShapeDtypeStruct((Bp, W, Np), jnp.float32)),
        grid=(Bp // bB,),
        in_specs=[
            pl.BlockSpec((bB, H * W, Kp), lambda i: (i, 0, 0)),
            pl.BlockSpec((Kp, Dp), lambda i: (0, 0)),
            pl.BlockSpec((1, Dp), lambda i: (0, 0)),
            pl.BlockSpec((Dp, Np), lambda i: (0, 0)),
            pl.BlockSpec((1, Np), lambda i: (0, 0)),
        ],
        out_specs=(
            pl.BlockSpec((bB, W, Np), lambda i: (i, 0, 0)),
            pl.BlockSpec((bB, W, Np), lambda i: (i, 0, 0)),
        ),
        scratch_shapes=[pltpu.VMEM((bB * H * W, Dp), jnp.float32)],
        compiler_params=pltpu.CompilerParams(dimension_semantics=("parallel",)),
    )(x_col, w_col, b_conv, w_dec, b_dec)

    return lsm[:B], logits[:B]            # (B, T, Np); padded class lanes ~ -1e30


# ----------------------------------------------------------------------------
# CTC loss (forward DP) — sequential, data-dependent recurrence; plain JAX.
# Matches torch.nn.CTCLoss(blank=0, reduction='mean', zero_infinity=True) with
# full-length inputs (pred_size = T for every batch element).
# Operates directly on (B, T, C) log-probs; only the small (B, T, 2L+1)
# emission tensor is transposed to time-major, not the full class array.
# ----------------------------------------------------------------------------
def ctc_loss(log_probs_btc, targets, target_lengths, blank=0):
    NEG = jnp.float32(-1e30)
    B, T, _ = log_probs_btc.shape
    L = targets.shape[1]
    S = 2 * L + 1

    ext = jnp.full((B, S), blank, dtype=jnp.int32)
    ext = ext.at[:, 1::2].set(targets.astype(jnp.int32))         # blank-interleaved

    idx = jnp.broadcast_to(ext[:, None, :], (B, T, S))
    emit = jnp.take_along_axis(log_probs_btc, idx, axis=2)       # (B, T, S)
    emit = jnp.transpose(emit, (1, 0, 2))                        # (T, B, S) — small

    ext_m2 = jnp.concatenate(
        [jnp.full((B, 2), -1, dtype=jnp.int32), ext[:, :-2]], axis=1)
    allowed = (jnp.arange(S)[None, :] >= 2) & (ext != blank) & (ext != ext_m2)

    def shift1(a):
        return jnp.concatenate([jnp.full((B, 1), NEG, a.dtype), a[:, :-1]], axis=1)

    def lse(*xs):
        x = jnp.stack(xs, axis=0)
        m = jnp.max(x, axis=0)
        return m + jnp.log(jnp.sum(jnp.exp(x - m), axis=0))

    alpha0 = jnp.where(jnp.arange(S)[None, :] < 2, emit[0], NEG)

    def step(alpha, emit_t):
        a1 = alpha
        a2 = shift1(alpha)
        a3 = jnp.where(allowed, shift1(shift1(alpha)), NEG)
        return emit_t + lse(a1, a2, a3), None

    alpha_T, _ = jax.lax.scan(step, alpha0, emit[1:])

    last = 2 * target_lengths.astype(jnp.int32)
    a_last = jnp.take_along_axis(alpha_T, last[:, None], axis=1)[:, 0]
    a_prev = jnp.take_along_axis(alpha_T, jnp.maximum(last - 1, 0)[:, None], axis=1)[:, 0]
    logp = lse(a_last, a_prev)
    loss = -logp
    loss = jnp.where(jnp.isfinite(loss) & (loss < 1e29), loss, 0.0)   # zero_infinity
    denom = jnp.maximum(target_lengths.astype(jnp.float32), 1.0)      # guard len==0
    return jnp.mean(loss / denom)                                     # reduction='mean'


# ----------------------------------------------------------------------------
# ModelBuilder_CTC forward
# ----------------------------------------------------------------------------
@jax.jit
def model_builder_ctc_forward(images, rec_targets, rec_lengths, params):
    num_classes = params["w_dec"].shape[1]

    # fused encoder (synthetic conv3x3 + ReLU + height-mean) + decoder + log_softmax
    lsm_btc, logits_btc = encoder_decoder_forward(images, params, num_classes)

    # CTC consumes the padded class dim directly (gather indices < num_classes),
    # avoiding an extra slice / transpose pass over the full (B, T, C) tensor.
    loss_rec = ctc_loss(lsm_btc, rec_targets, rec_lengths, blank=0)

    # eval-mode output: raw decoder logits in 'B T C' (rearrange T B C -> B T C
    # composed with B T C -> T B C is the identity, so no transposes).
    pred_rec = logits_btc[:, :, :num_classes]

    return {
        "loss": {"loss_rec": loss_rec},
        "output": {"pred_rec": pred_rec},
    }


if __name__ == "__main__":
    # small shapes consistent with the module's forward
    B, Cin, H, W = 2, 3, 8, 32          # images NCHW
    D_ENC = 32                          # encoder.out_planes (synthetic)
    NUM_CLASSES = 16                    # rec_num_classes (class 0 = CTC blank)
    LMAX = 5

    key = jax.random.PRNGKey(0)
    k1, k2, k3, k4 = jax.random.split(key, 4)

    params = {
        "w_conv": 0.1 * jax.random.normal(k1, (D_ENC, Cin, 3, 3), jnp.float32),
        "b_conv": jnp.zeros((D_ENC,), jnp.float32),
        "w_dec": 0.1 * jax.random.normal(k2, (D_ENC, NUM_CLASSES), jnp.float32),
        "b_dec": jnp.zeros((NUM_CLASSES,), jnp.float32),
    }

    images = jax.random.normal(k3, (B, Cin, H, W), jnp.float32)
    rec_targets = jax.random.randint(k4, (B, LMAX), 1, NUM_CLASSES).astype(jnp.int32)
    rec_lengths = jnp.array([5, 3], dtype=jnp.int32)

    out = model_builder_ctc_forward(images, rec_targets, rec_lengths, params)
    out = jax.block_until_ready(out)

    loss = out["loss"]["loss_rec"]
    pred = out["output"]["pred_rec"]
    assert pred.shape == (B, W, NUM_CLASSES)
    assert bool(jnp.isfinite(loss)) and bool(jnp.all(jnp.isfinite(pred)))
    print("KERNEL_OK")
</pallas_src>

<mosaic_0001>
module attributes {stable_mosaic.version = 11 : i64} {
  func.func @fused_encoder_decoder_kernel(%arg0: i32, %arg1: memref<1x256x32xbf16, #tpu.memory_space<vmem>>, %arg2: memref<32x128xbf16, #tpu.memory_space<vmem>>, %arg3: memref<1x128xf32, #tpu.memory_space<vmem>>, %arg4: memref<128x128xbf16, #tpu.memory_space<vmem>>, %arg5: memref<1x128xf32, #tpu.memory_space<vmem>>, %arg6: memref<1x32x128xf32, #tpu.memory_space<vmem>>, %arg7: memref<1x32x128xf32, #tpu.memory_space<vmem>>, %arg8: memref<256x128xf32, #tpu.memory_space<vmem>>) attributes {dimension_semantics = [#tpu.dimension_semantics<parallel>], iteration_bounds = array<i64: 2>, scalar_prefetch = 0 : i64, scratch_operands = 1 : i64, tpu.core_type = #tpu.core_type<tc>, window_params = [{transform_indices = @transform_0, window_bounds = array<i64: 1, 256, 32>}, {pipeline_mode = #tpu.pipeline_mode<synchronous>, transform_indices = @transform_1, window_bounds = array<i64: 32, 128>}, {pipeline_mode = #tpu.pipeline_mode<synchronous>, transform_indices = @transform_2, window_bounds = array<i64: 1, 128>}, {pipeline_mode = #tpu.pipeline_mode<synchronous>, transform_indices = @transform_3, window_bounds = array<i64: 128, 128>}, {pipeline_mode = #tpu.pipeline_mode<synchronous>, transform_indices = @transform_4, window_bounds = array<i64: 1, 128>}, {transform_indices = @transform_5, window_bounds = array<i64: 1, 32, 128>}, {transform_indices = @transform_6, window_bounds = array<i64: 1, 32, 128>}]} {
    %c0 = arith.constant 0 : index
    %c0_0 = arith.constant 0 : index
    %c0_1 = arith.constant 0 : index
    %0 = vector.load %arg1[%c0, %c0_0, %c0_1] : memref<1x256x32xbf16, #tpu.memory_space<vmem>>, vector<1x256x32xbf16>
    %1 = vector.shape_cast %0 : vector<1x256x32xbf16> to vector<256x32xbf16>
    %c0_2 = arith.constant 0 : index
    %c0_3 = arith.constant 0 : index
    %2 = vector.load %arg2[%c0_2, %c0_3] : memref<32x128xbf16, #tpu.memory_space<vmem>>, vector<32x128xbf16>
    %cst = arith.constant dense<0.000000e+00> : vector<256x128xf32>
    %3 = tpu.matmul %1, %2, %cst {dimension_numbers = #tpu.dot_dimension_numbers<[1], [0], [0], [1], [0, 0, 1, 1], [], []>} : vector<256x32xbf16>, vector<32x128xbf16>, vector<256x128xf32> -> vector<256x128xf32>
    %c0_4 = arith.constant 0 : index
    %c0_5 = arith.constant 0 : index
    %4 = vector.load %arg3[%c0_4, %c0_5] : memref<1x128xf32, #tpu.memory_space<vmem>>, vector<1x128xf32>
    %5 = vector.broadcast %4 : vector<1x128xf32> to vector<256x128xf32>
    %6 = arith.addf %3, %5 : vector<256x128xf32>
    %cst_6 = arith.constant 0.000000e+00 : f32
    %7 = vector.broadcast %cst_6 : f32 to vector<256x128xf32>
    %8 = arith.maximumf %6, %7 : vector<256x128xf32>
    %c0_7 = arith.constant 0 : index
    %c0_8 = arith.constant 0 : index
    %9 = vector.load %arg8[%c0_7, %c0_8] : memref<256x128xf32, #tpu.memory_space<vmem>>, vector<256x128xf32>
    tpu.vector_store %arg8[%c0_7, %c0_8], %8 {strides = array<i32>} : memref<256x128xf32, #tpu.memory_space<vmem>>, vector<256x128xf32>,
    %c0_9 = arith.constant 0 : index
    %c0_10 = arith.constant 0 : index
    %10 = vector.load %arg8[%c0_9, %c0_10] : memref<256x128xf32, #tpu.memory_space<vmem>>, vector<256x128xf32>
    %11 = vector.shape_cast %10 : vector<256x128xf32> to vector<1x8x32x128xf32>
    %cst_11 = arith.constant dense<0.000000e+00> : vector<1x32x128xf32>
    %12 = vector.multi_reduction <add>, %11, %cst_11 [1] : vector<1x8x32x128xf32> to vector<1x32x128xf32>
    %cst_12 = arith.constant 8.000000e+00 : f32
    %13 = vector.broadcast %cst_12 : f32 to vector<1x32x128xf32>
    %14 = arith.divf %12, %13 : vector<1x32x128xf32>
    %15 = arith.truncf %14 : vector<1x32x128xf32> to vector<1x32x128xbf16>
    %16 = vector.shape_cast %15 : vector<1x32x128xbf16> to vector<32x128xbf16>
    %c0_13 = arith.constant 0 : index
    %c0_14 = arith.constant 0 : index
    %17 = vector.load %arg4[%c0_13, %c0_14] : memref<128x128xbf16, #tpu.memory_space<vmem>>, vector<128x128xbf16>
    %cst_15 = arith.constant dense<0.000000e+00> : vector<32x128xf32>
    %18 = tpu.matmul %16, %17, %cst_15 {dimension_numbers = #tpu.dot_dimension_numbers<[1], [0], [0], [1], [0, 0, 1, 1], [], []>} : vector<32x128xbf16>, vector<128x128xbf16>, vector<32x128xf32> -> vector<32x128xf32>
    %c0_16 = arith.constant 0 : index
    %c0_17 = arith.constant 0 : index
    %19 = vector.load %arg5[%c0_16, %c0_17] : memref<1x128xf32, #tpu.memory_space<vmem>>, vector<1x128xf32>
    %20 = vector.broadcast %19 : vector<1x128xf32> to vector<32x128xf32>
    %21 = arith.addf %18, %20 : vector<32x128xf32>
    %cst_18 = arith.constant dense<0xFF800000> : vector<32xf32>
    %22 = vector.multi_reduction <maximumf>, %21, %cst_18 [1] : vector<32x128xf32> to vector<32xf32>
    %23 = vector.shape_cast %22 : vector<32xf32> to vector<32x1xf32>
    %24 = vector.broadcast %23 : vector<32x1xf32> to vector<32x128xf32>
    %25 = arith.subf %21, %24 : vector<32x128xf32>
    %26 = math.exp %25 : vector<32x128xf32>
    %cst_19 = arith.constant dense<0.000000e+00> : vector<32xf32>
    %27 = vector.multi_reduction <add>, %26, %cst_19 [1] : vector<32x128xf32> to vector<32xf32>
    %28 = vector.shape_cast %27 : vector<32xf32> to vector<32x1xf32>
    %29 = math.log %28 : vector<32x1xf32>
    %30 = arith.addf %23, %29 : vector<32x1xf32>
    %31 = vector.broadcast %30 : vector<32x1xf32> to vector<32x128xf32>
    %32 = arith.subf %21, %31 : vector<32x128xf32>
    %33 = vector.shape_cast %32 : vector<32x128xf32> to vector<1x32x128xf32>
    %c0_20 = arith.constant 0 : index
    %c0_21 = arith.constant 0 : index
    %c0_22 = arith.constant 0 : index
    %34 = vector.load %arg6[%c0_20, %c0_21, %c0_22] : memref<1x32x128xf32, #tpu.memory_space<vmem>>, vector<1x32x128xf32>
    tpu.vector_store %arg6[%c0_20, %c0_21, %c0_22], %33 {strides = array<i32>} : memref<1x32x128xf32, #tpu.memory_space<vmem>>, vector<1x32x128xf32>,
    %35 = vector.shape_cast %21 : vector<32x128xf32> to vector<1x32x128xf32>
    %c0_23 = arith.constant 0 : index
    %c0_24 = arith.constant 0 : index
    %c0_25 = arith.constant 0 : index
    %36 = vector.load %arg7[%c0_23, %c0_24, %c0_25] : memref<1x32x128xf32, #tpu.memory_space<vmem>>, vector<1x32x128xf32>
    tpu.vector_store %arg7[%c0_23, %c0_24, %c0_25], %35 {strides = array<i32>} : memref<1x32x128xf32, #tpu.memory_space<vmem>>, vector<1x32x128xf32>,
    return
  }
  func.func @transform_0(%arg0: i32) -> (i32, i32, i32) {
    %c0_i32 = arith.constant 0 : i32
    %c0_i32_0 = arith.constant 0 : i32
    %c0_i32_1 = arith.constant 0 : i32
    return %arg0, %c0_i32, %c0_i32_0 : i32, i32, i32
  }
  func.func @transform_1(%arg0: i32) -> (i32, i32) {
    %c0_i32 = arith.constant 0 : i32
    %c0_i32_0 = arith.constant 0 : i32
    %c0_i32_1 = arith.constant 0 : i32
    return %c0_i32, %c0_i32_0 : i32, i32
  }
  func.func @transform_2(%arg0: i32) -> (i32, i32) {
    %c0_i32 = arith.constant 0 : i32
    %c0_i32_0 = arith.constant 0 : i32
    %c0_i32_1 = arith.constant 0 : i32
    return %c0_i32, %c0_i32_0 : i32, i32
  }
  func.func @transform_3(%arg0: i32) -> (i32, i32) {
    %c0_i32 = arith.constant 0 : i32
    %c0_i32_0 = arith.constant 0 : i32
    %c0_i32_1 = arith.constant 0 : i32
    return %c0_i32, %c0_i32_0 : i32, i32
  }
  func.func @transform_4(%arg0: i32) -> (i32, i32) {
    %c0_i32 = arith.constant 0 : i32
    %c0_i32_0 = arith.constant 0 : i32
    %c0_i32_1 = arith.constant 0 : i32
    return %c0_i32, %c0_i32_0 : i32, i32
  }
  func.func @transform_5(%arg0: i32) -> (i32, i32, i32) {
    %c0_i32 = arith.constant 0 : i32
    %c0_i32_0 = arith.constant 0 : i32
    %c0_i32_1 = arith.constant 0 : i32
    return %arg0, %c0_i32, %c0_i32_0 : i32, i32, i32
  }
  func.func @transform_6(%arg0: i32) -> (i32, i32, i32) {
    %c0_i32 = arith.constant 0 : i32
    %c0_i32_0 = arith.constant 0 : i32
    %c0_i32_1 = arith.constant 0 : i32
    return %arg0, %c0_i32, %c0_i32_0 : i32, i32, i32
  }
}

</mosaic_0001>

<bundles_post_ra>
// kernel: model_builder_ctc_forward.1
= control target key start
LH: loop header
LB: loop body
LE: loop exit
PB: predicated region body
PF: predicated region fallthrough
CT: control target
= control target key end

     0   :  { %s1239_s21 = smov 0   ;;  %s1377_s0 = inlined_call_operand.vmem [shape: bf16[2,256,32], index: 0, kind: input, shape index: {}]   ;;  %s1378_s1 = inlined_call_operand.vmem [shape: bf16[32,128], index: 1, kind: input, shape index: {}]   ;;  %s1379_s2 = inlined_call_operand.vmem [shape: f32[1,128], index: 2, kind: input, shape index: {}]   ;;  %s1380_s3 = inlined_call_operand.vmem [shape: bf16[128,128], index: 3, kind: input, shape index: {}]   ;;  %s1381_s4 = inlined_call_operand.vmem [shape: f32[1,128], index: 4, kind: input, shape index: {}]   ;;  %s1382_s5 = inlined_call_operand.vmem [shape: f32[2,32,128], index: 5, kind: output, shape index: {0}]   ;;  %s1383_s6 = inlined_call_operand.vmem [shape: f32[2,32,128], index: 6, kind: output, shape index: {1}]  }
   0x1 LB: > { %s1002_s22 = sadd.s32 4294967295, %s1202_s21   ;;  %p1006_p0 = scmp.ge.s32.totalorder %s1202_s21, 1  ;;  %s1202_s21 = sphi %s1239_s21, %s17_s21  }
   0x2   : > { %p215_p1 = scmp.lt.s32.totalorder %s1202_s21, 3 }
   0x4   : > { %p216_p2 = pnand %p1006_p0, %p215_p1 }
   0x5   : > { %v1154_v0 = vld [vmem:[%s1378_s1] sm:$0xff] (!%p216_p2)   ;;  %p250_p3 = scmp.lt.s32.totalorder (!%p216_p2), %s1002_s22, 1  ;;  %v1155_v1 = vld [vmem:[%s1378_s1 + $0x8] sm:$0xff] (!%p216_p2)   ;;  %vm401_vm0 = vcmask (!%p216_p2), 261120   ;;  %v1174_v20 = vld [vmem:[%s1380_s3 + $0x10] sm:$0xff] (!%p216_p2)  }
   0x6   : > { %219 = sbr.rel (%p216_p2) target bundleno = 840 (0x348), region = 40  ;;  %1090 = vmatprep.subr.bf16.mxu0 (!%p216_p2), %v1154_v0  ;;  %v1172_v18 = vld [vmem:[%s1380_s3] sm:$0xff] (!%p216_p2)   ;;  %v1173_v19 = vld [vmem:[%s1380_s3 + $0x8] sm:$0xff] (!%p216_p2)   ;;  %v1175_v21 = vld [vmem:[%s1380_s3 + $0x18] sm:$0xff] (!%p216_p2)  }
   0x7   : > { %1091 = vmatpush3.bf16.msra.mxu0 (!%p216_p2), %v1154_v0  ;;  %1126 = vmatprep.subr.bf16.mxu1 (!%p216_p2), %v1172_v18  ;;  %v1176_v22 = vld [vmem:[%s1380_s3 + $0x20] sm:$0xff] (!%p216_p2)   ;;  %v1177_v23 = vld [vmem:[%s1380_s3 + $0x28] sm:$0xff] (!%p216_p2)   ;;  %v1178_v24 = vld [vmem:[%s1380_s3 + $0x30] sm:$0xff] (!%p216_p2)  }
   0x8   : > { %1092 = vmatprep.subr.bf16.mxu0 (!%p216_p2), %v1155_v1  ;;  %1127 = vmatpush3.bf16.msra.mxu1 (!%p216_p2), %v1172_v18  ;;  %v1179_v25 = vld [vmem:[%s1380_s3 + $0x38] sm:$0xff] (!%p216_p2)   ;;  %v1320_v30 = vld [vmem:[%s1379_s2] ss:$0 sm:$0xff] (!%p216_p2) }
   0x9   : > { %1128 = vmatprep.subr.bf16.mxu1 (!%p216_p2), %v1173_v19 }
   0xb   : > { %1093 = vmatpush3.bf16.msra.mxu0 (!%p216_p2), %v1155_v1 }
   0xc   : > { %1129 = vmatpush3.bf16.msra.mxu1 (!%p216_p2), %v1173_v19 }
   0xd   : > { %s1385_s22 = smov (!%p250_p3, %s1002_s22), 1  ;;  %1130 = vmatprep.subr.bf16.mxu1 %v1174_v20 }
   0xe   : > { %s1059_s27 = sshll.u32 %s1385_s22, 7 }
   0xf   : > { %s1259_s30 = scalar_lea.vmem %s1377_s0, %s1059_s27  ;;  %s1060_s27 = sshll.u32 %s1385_s22, 5 }
  0x10   : > { %v1156_v2 = vld [vmem:[%s1259_s30] sm:$0xff]   ;;  %v1157_v3 = vld [vmem:[%s1259_s30 + $0x8] sm:$0xff]   ;;  %v1158_v4 = vld [vmem:[%s1259_s30 + $0x10] sm:$0xff]   ;;  %1131 = vmatpush3.bf16.msra.mxu1 %v1174_v20  ;;  %s264_s8 = scalar_lea.vmem %s1383_s6, %s1060_s27  ;;  %s259_s11 = scalar_lea.vmem %s1382_s5, %s1060_s27 }
  0x11   : > { %1094 = vmatprep.mubr.msk.bf16.mxu0 %vm401_vm0, %v1156_v2  ;;  %v1159_v5 = vld [vmem:[%s1259_s30 + $0x18] sm:$0xff]   ;;  %v1160_v6 = vld [vmem:[%s1259_s30 + $0x20] sm:$0xff]   ;;  %v1161_v7 = vld [vmem:[%s1259_s30 + $0x28] sm:$0xff]   ;;  %1132 = vmatprep.subr.bf16.mxu1 %v1175_v21 }
  0x12   : > { %1095 = vmatmul.mubr.msk.bf16.vlgmr.msra.gmra.mrb[0].mxu0 %vm401_vm0, %v1157_v3  ;;  %v1162_v8 = vld [vmem:[%s1259_s30 + $0x30] sm:$0xff]   ;;  %v1163_v9 = vld [vmem:[%s1259_s30 + $0x38] sm:$0xff]   ;;  %v1164_v10 = vld [vmem:[%s1259_s30 + $0x40] sm:$0xff]  }
  0x13   : > { %1098 = vmatprep.mubr.msk.bf16.mxu0 %vm401_vm0, %v1158_v4  ;;  %v1165_v11 = vld [vmem:[%s1259_s30 + $0x48] sm:$0xff]   ;;  %v1166_v12 = vld [vmem:[%s1259_s30 + $0x50] sm:$0xff]   ;;  %v1167_v13 = vld [vmem:[%s1259_s30 + $0x58] sm:$0xff]  }
  0x14   : > { %v1168_v14 = vld [vmem:[%s1259_s30 + $0x60] sm:$0xff]   ;;  %v1169_v15 = vld [vmem:[%s1259_s30 + $0x68] sm:$0xff]   ;;  %v1170_v16 = vld [vmem:[%s1259_s30 + $0x70] sm:$0xff]   ;;  %1133 = vmatpush3.bf16.msra.mxu1 %v1175_v21 }
  0x15   : > { %v1171_v17 = vld [vmem:[%s1259_s30 + $0x78] sm:$0xff]   ;;  %1134 = vmatprep.subr.bf16.mxu1 %v1176_v22 }
  0x18   : > { %1135 = vmatpush3.bf16.msra.mxu1 %v1176_v22 }
  0x19   : > { %1136 = vmatprep.subr.bf16.mxu1 %v1177_v23 }
  0x1a   : > { %1099 = vmatmul.mubr.msk.bf16.gmra.mrb[4].mxu0 %vm401_vm0, %v1159_v5 }
  0x1b   : > { %1102 = vmatprep.mubr.msk.bf16.mxu0 %vm401_vm0, %v1160_v6 }
  0x1c   : > { %1137 = vmatpush3.bf16.msra.mxu1 %v1177_v23 }
  0x1d   : > { %1138 = vmatprep.subr.bf16.mxu1 %v1178_v24 }
  0x20   : > { %1139 = vmatpush3.bf16.msra.mxu1 %v1178_v24 }
  0x21   : > { %1140 = vmatprep.subr.bf16.mxu1 %v1179_v25 }
  0x22   : > { %1103 = vmatmul.mubr.msk.bf16.gmra.mrb[8].mxu0 %vm401_vm0, %v1161_v7 }
  0x23   : > { %1106 = vmatprep.mubr.msk.bf16.mxu0 %vm401_vm0, %v1162_v8 }
  0x24   : > { %1141 = vmatpush3.bf16.msra.mxu1 %v1179_v25 }
  0x2a   : > { %1107 = vmatmul.mubr.msk.bf16.gmra.mrb[12].mxu0 %vm401_vm0, %v1163_v9 }
  0x2b   : > { %1110 = vmatprep.mubr.msk.bf16.mxu0 %vm401_vm0, %v1164_v10 }
  0x32   : > { %1111 = vmatmul.mubr.msk.bf16.gmra.mrb[16].mxu0 %vm401_vm0, %v1165_v11 }
  0x33   : > { %1114 = vmatprep.mubr.msk.bf16.mxu0 %vm401_vm0, %v1166_v12 }
  0x3a   : > { %1115 = vmatmul.mubr.msk.bf16.gmra.mrb[20].mxu0 %vm401_vm0, %v1167_v13 }
  0x3b   : > { %1118 = vmatprep.mubr.msk.bf16.mxu0 %vm401_vm0, %v1168_v14 }
  0x42   : > { %1119 = vmatmul.mubr.msk.bf16.gmra.mrb[24].mxu0 %vm401_vm0, %v1169_v15 }
  0x43   : > { %1122 = vmatprep.mubr.msk.bf16.mxu0 %vm401_vm0, %v1170_v16 }
  0x4a   : > { %1123 = vmatmul.mubr.msk.bf16.gmra.mrb[28].mxu0 %vm401_vm0, %v1171_v17 }
  0xe5   : > { %v1096_v26 = vpop.f32.mrb[0].mxu0 }
  0xe6   : > { %v484_v27 = vpop.f32.mrb[1].mxu0  ;;  %v493_v31 = vadd.f32 %v1096_v26, %v1320_v30 }
  0xe7   : > { %v1097_v28 = vpop.f32.mrb[2].mxu0  ;;  %v485_v32 = vadd.f32 %v1320_v30, %v484_v27 }
  0xe8   : > { %v487_v29 = vpop.f32.mrb[3].mxu0  ;;  %v496_v34 = vadd.f32 %v1097_v28, %v1320_v30  ;;  %v613_v40 = vmax.f32 %v493_v31, 0.0 }
  0xe9   : > { %v488_v37 = vadd.f32 %v1320_v30, %v487_v29  ;;  %v611_v44 = vmax.f32 %v485_v32, 0.0 }
  0xea   : > { %v614_v47 = vmax.f32 %v496_v34, 0.0 }
  0xeb   : > { %v612_v50 = vmax.f32 %v488_v37, 0.0 }
  0xed   : > { %v1100_v33 = vpop.f32.mrb[4].mxu0 }
  0xee   : > { %v509_v35 = vadd.f32 %v1100_v33, %v1320_v30  ;;  %v500_v36 = vpop.f32.mrb[5].mxu0 }
  0xef   : > { %v501_v38 = vadd.f32 %v1320_v30, %v500_v36  ;;  %v1101_v39 = vpop.f32.mrb[6].mxu0 }
  0xf0   : > { %v617_v41 = vmax.f32 %v509_v35, 0.0  ;;  %v512_v42 = vadd.f32 %v1101_v39, %v1320_v30  ;;  %v503_v43 = vpop.f32.mrb[7].mxu0 }
  0xf1   : > { %v615_v45 = vmax.f32 %v501_v38, 0.0  ;;  %v504_v46 = vadd.f32 %v1320_v30, %v503_v43 }
  0xf2   : > { %v721_v48 = vadd.f32 %v617_v41, %v613_v40  ;;  %v618_v49 = vmax.f32 %v512_v42, 0.0 }
  0xf3   : > { %v707_v51 = vadd.f32 %v615_v45, %v611_v44  ;;  %v616_v52 = vmax.f32 %v504_v46, 0.0 }
  0xf4   : > { %v728_v53 = vadd.f32 %v618_v49, %v614_v47 }
  0xf5   : > { %v714_v54 = vadd.f32 %v616_v52, %v612_v50  ;;  %v1104_v55 = vpop.f32.mrb[8].mxu0 }
  0xf6   : > { %v525_v56 = vadd.f32 %v1104_v55, %v1320_v30  ;;  %v516_v57 = vpop.f32.mrb[9].mxu0 }
  0xf7   : > { %v517_v58 = vadd.f32 %v1320_v30, %v516_v57  ;;  %v1105_v59 = vpop.f32.mrb[10].mxu0 }
  0xf8   : > { %v621_v60 = vmax.f32 %v525_v56, 0.0  ;;  %v528_v61 = vadd.f32 %v1105_v59, %v1320_v30  ;;  %v519_v62 = vpop.f32.mrb[11].mxu0 }
  0xf9   : > { %v619_v63 = vmax.f32 %v517_v58, 0.0  ;;  %v520_v0 = vadd.f32 %v1320_v30, %v519_v62 }
  0xfa   : > { %v722_v1 = vadd.f32 %v721_v48, %v621_v60  ;;  %v622_v2 = vmax.f32 %v528_v61, 0.0 }
  0xfb   : > { %v708_v3 = vadd.f32 %v707_v51, %v619_v63  ;;  %v620_v4 = vmax.f32 %v520_v0, 0.0 }
  0xfc   : > { %v729_v5 = vadd.f32 %v728_v53, %v622_v2 }
  0xfd   : > { %v715_v6 = vadd.f32 %v714_v54, %v620_v4  ;;  %v1108_v7 = vpop.f32.mrb[12].mxu0 }
  0xfe   : > { %v541_v8 = vadd.f32 %v1108_v7, %v1320_v30  ;;  %v532_v9 = vpop.f32.mrb[13].mxu0 }
  0xff   : > { %v533_v10 = vadd.f32 %v1320_v30, %v532_v9  ;;  %v1109_v11 = vpop.f32.mrb[14].mxu0 }
 0x100   : > { %v625_v12 = vmax.f32 %v541_v8, 0.0  ;;  %v544_v13 = vadd.f32 %v1109_v11, %v1320_v30  ;;  %v535_v14 = vpop.f32.mrb[15].mxu0 }
 0x101   : > { %v623_v15 = vmax.f32 %v533_v10, 0.0  ;;  %v536_v16 = vadd.f32 %v1320_v30, %v535_v14 }
 0x102   : > { %v723_v17 = vadd.f32 %v722_v1, %v625_v12  ;;  %v626_v18 = vmax.f32 %v544_v13, 0.0 }
 0x103   : > { %v709_v19 = vadd.f32 %v708_v3, %v623_v15  ;;  %v624_v20 = vmax.f32 %v536_v16, 0.0 }
 0x104   : > { %v730_v21 = vadd.f32 %v729_v5, %v626_v18 }
 0x105   : > { %v716_v22 = vadd.f32 %v715_v6, %v624_v20  ;;  %v1112_v23 = vpop.f32.mrb[16].mxu0 }
 0x106   : > { %v557_v24 = vadd.f32 %v1112_v23, %v1320_v30  ;;  %v548_v25 = vpop.f32.mrb[17].mxu0 }
 0x107   : > { %v549_v26 = vadd.f32 %v1320_v30, %v548_v25  ;;  %v1113_v27 = vpop.f32.mrb[18].mxu0 }
 0x108   : > { %v629_v28 = vmax.f32 %v557_v24, 0.0  ;;  %v560_v29 = vadd.f32 %v1113_v27, %v1320_v30  ;;  %v551_v31 = vpop.f32.mrb[19].mxu0 }
 0x109   : > { %v627_v32 = vmax.f32 %v549_v26, 0.0  ;;  %v552_v33 = vadd.f32 %v1320_v30, %v551_v31 }
 0x10a   : > { %v724_v34 = vadd.f32 %v723_v17, %v629_v28  ;;  %v630_v35 = vmax.f32 %v560_v29, 0.0 }
 0x10b   : > { %v710_v36 = vadd.f32 %v709_v19, %v627_v32  ;;  %v628_v37 = vmax.f32 %v552_v33, 0.0 }
 0x10c   : > { %v731_v38 = vadd.f32 %v730_v21, %v630_v35 }
 0x10d   : > { %v717_v39 = vadd.f32 %v716_v22, %v628_v37  ;;  %v1116_v40 = vpop.f32.mrb[20].mxu0 }
 0x10e   : > { %v573_v41 = vadd.f32 %v1116_v40, %v1320_v30  ;;  %v564_v42 = vpop.f32.mrb[21].mxu0 }
 0x10f   : > { %v565_v43 = vadd.f32 %v1320_v30, %v564_v42  ;;  %v1117_v44 = vpop.f32.mrb[22].mxu0 }
 0x110   : > { %v633_v45 = vmax.f32 %v573_v41, 0.0  ;;  %v576_v46 = vadd.f32 %v1117_v44, %v1320_v30  ;;  %v567_v47 = vpop.f32.mrb[23].mxu0 }
 0x111   : > { %v631_v48 = vmax.f32 %v565_v43, 0.0  ;;  %v568_v49 = vadd.f32 %v1320_v30, %v567_v47 }
 0x112   : > { %v725_v50 = vadd.f32 %v724_v34, %v633_v45  ;;  %v634_v51 = vmax.f32 %v576_v46, 0.0 }
 0x113   : > { %v711_v52 = vadd.f32 %v710_v36, %v631_v48  ;;  %v632_v53 = vmax.f32 %v568_v49, 0.0 }
 0x114   : > { %v732_v54 = vadd.f32 %v731_v38, %v634_v51 }
 0x115   : > { %v718_v55 = vadd.f32 %v717_v39, %v632_v53  ;;  %v1120_v56 = vpop.f32.mrb[24].mxu0 }
 0x116   : > { %v589_v57 = vadd.f32 %v1120_v56, %v1320_v30  ;;  %v580_v58 = vpop.f32.mrb[25].mxu0 }
 0x117   : > { %v581_v59 = vadd.f32 %v1320_v30, %v580_v58  ;;  %v1121_v60 = vpop.f32.mrb[26].mxu0 }
 0x118   : > { %v637_v61 = vmax.f32 %v589_v57, 0.0  ;;  %v592_v62 = vadd.f32 %v1121_v60, %v1320_v30  ;;  %v583_v63 = vpop.f32.mrb[27].mxu0 }
 0x119   : > { %v635_v0 = vmax.f32 %v581_v59, 0.0  ;;  %v584_v1 = vadd.f32 %v1320_v30, %v583_v63 }
 0x11a   : > { %v726_v2 = vadd.f32 %v725_v50, %v637_v61  ;;  %v638_v3 = vmax.f32 %v592_v62, 0.0 }
 0x11b   : > { %v712_v4 = vadd.f32 %v711_v52, %v635_v0  ;;  %v636_v5 = vmax.f32 %v584_v1, 0.0 }
 0x11c   : > { %v733_v6 = vadd.f32 %v732_v54, %v638_v3 }
 0x11d   : > { %v719_v7 = vadd.f32 %v718_v55, %v636_v5  ;;  %v1124_v8 = vpop.f32.mrb[28].mxu0 }
 0x11e   : > { %v605_v9 = vadd.f32 %v1124_v8, %v1320_v30  ;;  %v596_v10 = vpop.f32.mrb[29].mxu0 }
 0x11f   : > { %v597_v11 = vadd.f32 %v1320_v30, %v596_v10  ;;  %v1125_v12 = vpop.f32.mrb[30].mxu0 }
 0x120   : > { %v641_v13 = vmax.f32 %v605_v9, 0.0  ;;  %v608_v14 = vadd.f32 %v1125_v12, %v1320_v30  ;;  %v599_v15 = vpop.f32.mrb[31].mxu0 }
 0x121   : > { %v639_v16 = vmax.f32 %v597_v11, 0.0  ;;  %v600_v17 = vadd.f32 %v1320_v30, %v599_v15  ;;  %v1048_v30 = vld [vmem:[%s1381_s4] ss:$0 sm:$0xff] }
 0x122   : > { %v727_v18 = vadd.f32 %v726_v2, %v641_v13  ;;  %v642_v19 = vmax.f32 %v608_v14, 0.0 }
 0x123   : > { %v640_v20 = vmax.f32 %v600_v17, 0.0  ;;  %v713_v21 = vadd.f32 %v712_v4, %v639_v16 }
 0x124   : > { %v734_v22 = vadd.f32 %v733_v6, %v642_v19  ;;  %v738_v24 = vmul.f32 0.125, %v727_v18 }
 0x125   : > { %v720_v23 = vadd.f32 %v719_v7, %v640_v20  ;;  %v736_v26 = vmul.f32 0.125, %v713_v21 }
 0x126   : > { %v739_v25 = vmul.f32 0.125, %v734_v22 }
 0x127   : > { %v737_v27 = vmul.f32 0.125, %v720_v23 }
 0x128   : > { %v741_v28 = vpack.c.bf16 %v739_v25, %v738_v24 }
 0x129   : > { %v740_v29 = vpack.c.bf16 %v737_v27, %v736_v26 }
 0x12b   : > { %1142 = vmatprep.mubr.bf16.mxu1 %v740_v29 }
 0x12c   : > { %1143 = vmatmul.mubr.bf16.vlgmr.msra.gmra.mrb[0].mxu1 %v741_v28 }
 0x1ff   : > { %v1144_v31 = vpop.f32.mrb[0].mxu1 }
 0x200   : > { %v1363_v32 = vadd.f32 %v1144_v31, %v1048_v30  ;;  %v847_v33 = vpop.f32.mrb[1].mxu1 }
 0x201   : > { %v848_v34 = vadd.f32 %v1048_v30, %v847_v33  ;;  %v1145_v35 = vpop.f32.mrb[2].mxu1 }
 0x202   : > { %912 = vst [vmem:[%s264_s8 + $0x10] sm:$0xff] %v1363_v32  ;;  %v859_v36 = vadd.f32 %v1145_v35, %v1048_v30  ;;  %866 = vmax.xlane.f32.xlu1 %v1363_v32  ;;  %v850_v37 = vpop.f32.mrb[3].mxu1 }
 0x203   : > { %910 = vst [vmem:[%s264_s8] sm:$0xff] %v848_v34  ;;  %v851_v38 = vadd.f32 %v1048_v30, %v850_v37  ;;  %862 = vmax.xlane.f32.xlu0 %v848_v34 }
 0x204   : > { %913 = vst [vmem:[%s264_s8 + $0x18] sm:$0xff] %v859_v36 }
 0x205   : > { %911 = vst [vmem:[%s264_s8 + $0x8] sm:$0xff] %v851_v38 }
 0x206   : > { %868 = vmax.xlane.f32.xlu1 %v859_v36 }
 0x207   : > { %864 = vmax.xlane.f32.xlu0 %v851_v38 }
 0x28f   : > { %v867_v39 = vpop.xlane.xlu1 %866 }
 0x290   : > { %v872_v40 = vsub.f32 %v1363_v32, %v867_v39  ;;  %v863_v41 = vpop.xlane.xlu0 %862 }
 0x291   : > { %v870_v42 = vsub.f32 %v848_v34, %v863_v41 }
 0x292   : > { %v878_v45 = vmul.f32 1.442695, %v872_v40 }
 0x293   : > { %v874_v43 = vmul.f32 1.442695, %v870_v42  ;;  %v869_v44 = vpop.xlane.xlu1 %868 }
 0x294   : > { %v865_v46 = vpop.xlane.xlu0 %864  ;;  %v873_v47 = vsub.f32 %v859_v36, %v869_v44 }
 0x295   : > { %1180 = vpow2.f32 %v874_v43  ;;  %v871_v48 = vsub.f32 %v851_v38, %v865_v46 }
 0x296   : > { %1182 = vpow2.f32 %v878_v45  ;;  %v880_v50 = vmul.f32 1.442695, %v873_v47 }
 0x297   : > { %v876_v49 = vmul.f32 1.442695, %v871_v48 }
 0x299   : > { %1184 = vpow2.f32 %v876_v49 }
 0x29a   : > { %1186 = vpow2.f32 %v880_v50 }
 0x29f   : > { %v1181_v51 = vpop.eup %1180 }
 0x2a0   : > { %882 = vadd.xlane.f32.xlu0 %v1181_v51  ;;  %v1183_v52 = vpop.eup %1182 }
 0x2a3   : > { %v1185_v53 = vpop.eup %1184 }
 0x2a4   : > { %886 = vadd.xlane.f32.xlu0 %v1183_v52  ;;  %884 = vadd.xlane.f32.xlu1 %v1185_v53  ;;  %v1187_v54 = vpop.eup %1186 }
 0x2a8   : > { %888 = vadd.xlane.f32.xlu1 %v1187_v54 }
 0x32d   : > { %v883_v55 = vpop.xlane.xlu0 %882 }
 0x32e   : > { %1188 = vlog2.f32 %v883_v55 }
 0x331   : > { %v885_v56 = vpop.xlane.xlu1 %884  ;;  %v887_v57 = vpop.xlane.xlu0 %886 }
 0x332   : > { %1190 = vlog2.f32 %v885_v56 }
 0x333   : > { %1192 = vlog2.f32 %v887_v57 }
 0x335   : > { %v889_v58 = vpop.xlane.xlu1 %888 }
 0x336   : > { %1194 = vlog2.f32 %v889_v58 }
 0x338   : > { %v1189_v59 = vpop.eup %1188 }
 0x339   : > { %v891_v60 = vmul.f32 0.6931472, %v1189_v59 }
 0x33b   : > { %v898_v61 = vadd.f32 %v891_v60, %v863_v41 }
 0x33c   : > { %v1191_v62 = vpop.eup %1190 }
 0x33d   : > { %v1193_v63 = vpop.eup %1192  ;;  %v902_v0 = vsub.f32 %v848_v34, %v898_v61  ;;  %v893_v1 = vmul.f32 0.6931472, %v1191_v62 }
 0x33e   : > { %v895_v2 = vmul.f32 0.6931472, %v1193_v63 }
 0x33f   : > { %906 = vst [vmem:[%s259_s11] sm:$0xff] %v902_v0  ;;  %v899_v3 = vadd.f32 %v893_v1, %v865_v46 }
 0x340   : > { %v1195_v4 = vpop.eup %1194  ;;  %v900_v5 = vadd.f32 %v895_v2, %v867_v39 }
 0x341   : > { %v903_v6 = vsub.f32 %v851_v38, %v899_v3  ;;  %v897_v7 = vmul.f32 0.6931472, %v1195_v4 }
 0x342   : > { %v904_v8 = vsub.f32 %v1363_v32, %v900_v5 }
 0x343   : > { %907 = vst [vmem:[%s259_s11 + $0x8] sm:$0xff] %v903_v6  ;;  %v901_v9 = vadd.f32 %v897_v7, %v869_v44 }
 0x344   : > { %908 = vst [vmem:[%s259_s11 + $0x10] sm:$0xff] %v904_v8 }
 0x345   : > { %v905_v10 = vsub.f32 %v859_v36, %v901_v9 }
 0x347   : > { %909 = vst [vmem:[%s259_s11 + $0x18] sm:$0xff] %v905_v10 }
 0x348 PF: > { %s17_s21 = sadd.s32 1, %s1202_s21  }
 0x349   : > { %p14_p4 = scmp.ge.s32.totalorder %s17_s21, 4  }
 0x34b   :  { %16 = sbr.rel (!%p14_p4) target bundleno = 1 (0x1), region = 82 }

</bundles_post_ra>
